<compile_context>
chip_gen: v6e
topology: v6e:2x2x1
jax: 0.10.0
libtpu: 0.0.40
codegen_flags: <defaults>
</compile_context>

<pallas_src>
import jax
import jax.numpy as jnp
from jax.experimental import pallas as pl
from jax.experimental.pallas import tpu as pltpu


def _identity_kernel(x_ref, o_ref):
    # Trivial touch: identity copy of the single VMEM-resident tile.
    o_ref[...] = x_ref[...]


@jax.jit
def _identity_pallas(x):
    """Minimal no-op kernel: one whole-array VMEM block, no grid, aliased I/O."""
    return pl.pallas_call(
        _identity_kernel,
        out_shape=jax.ShapeDtypeStruct(x.shape, x.dtype),
        in_specs=[pl.BlockSpec(memory_space=pltpu.MemorySpace.VMEM)],
        out_specs=pl.BlockSpec(memory_space=pltpu.MemorySpace.VMEM),
        input_output_aliases={0: 0},
    )(x)


class PlaceholderModelPallas:
    """JAX/Pallas equivalent of the PyTorch PlaceholderModel."""

    def __init__(self, *args, **kwargs):
        # No parameters — matches the PyTorch __init__.
        pass

    def forward(self):
        # PyTorch forward() is `pass` -> returns None.  Highest-value
        # optimization: launch no kernel, allocate nothing, never sync.
        return None

    __call__ = forward


if __name__ == "__main__":
    # Deterministic example input for the structural kernel sanity check.
    # (The module's forward() itself takes no inputs.)
    key = jax.random.PRNGKey(0)
    x = jax.random.normal(key, (8, 128), dtype=jnp.float32)

    # Run the (optimized) no-op kernel once and block on its result.
    y = jax.block_until_ready(_identity_pallas(x))
    assert y.shape == x.shape and y.dtype == x.dtype
    assert bool(jnp.allclose(y, x))

    # Module-level forward: must return None, like the PyTorch module,
    # and performs zero device work.
    model = PlaceholderModelPallas()
    result = model.forward()
    assert result is None

    print("KERNEL_OK")
</pallas_src>

<mosaic_0001>
module attributes {stable_mosaic.version = 11 : i64} {
  func.func @_identity_kernel(%arg0: memref<8x128xf32, #tpu.memory_space<vmem>>, %arg1: memref<8x128xf32, #tpu.memory_space<vmem>>) attributes {dimension_semantics = [], scalar_prefetch = 0 : i64, scratch_operands = 0 : i64, tpu.core_type = #tpu.core_type<tc>} {
    %c0 = arith.constant 0 : index
    %c0_0 = arith.constant 0 : index
    %0 = vector.load %arg0[%c0, %c0_0] : memref<8x128xf32, #tpu.memory_space<vmem>>, vector<8x128xf32>
    %c0_1 = arith.constant 0 : index
    %c0_2 = arith.constant 0 : index
    %1 = vector.load %arg1[%c0_1, %c0_2] : memref<8x128xf32, #tpu.memory_space<vmem>>, vector<8x128xf32>
    tpu.vector_store %arg1[%c0_1, %c0_2], %0 {strides = array<i32>} : memref<8x128xf32, #tpu.memory_space<vmem>>, vector<8x128xf32>,
    return
  }
}

</mosaic_0001>

<bundles_post_ra>
// kernel: _identity_pallas.1
= control target key start
LH: loop header
LB: loop body
LE: loop exit
PB: predicated region body
PF: predicated region fallthrough
CT: control target
= control target key end

     0   :  { %6 = vsyncpa [#allocation3], 0  ;;  %s102_s0 = inlined_call_operand.hbm [shape: f32[8,128], index: 0, kind: input, shape index: {}, may-alias: {0,1}]   ;;  %s103_s1 = inlined_call_operand.hbm [shape: f32[8,128], index: 1, kind: output, shape index: {}, may-alias: {0,1}]  }
   0x1   :  { %7 = vsyncpa [#allocation4], 0  ;;  %s84_s6 = smov [#allocation2]  }
   0x2   :  { %s14_s7 = sshll.u32 %s84_s6, 4  ;;  %s15_s7 = int_to_ptr.vmem [resolvable:$true] %s14_s7 }
   0x3   :  { %s48_s8 = scalar_lea.vmem %s15_s7, 128  ;;  %p53_p1 = scmp.lt.s32.totalorder %s15_s7, %s15_s7 }
   0x4   :  { %p49_p0 = scmp.ne.s32.totalorder %s15_s7, %s48_s8  ;;  %p54_p2 = scmp.lt.s32.totalorder %s48_s8, %s48_s8 }
   0x6   :  { %p55_p3 = por %p54_p2, %p53_p1 }
   0x8   :  { %p56_p4 = pnand %p55_p3, %p49_p0 }
   0xa   :  { %59 = shalt.err (!%p56_p4)
}
   0xb   :  { %17 = dma.hbm_to_vmem [thread:$0]  %s102_s0, 128, %s15_s7, [#allocation3]  }
   0xc   :  { %80 = dma.done.wait [#allocation3], 128  }
   0xd   :  { %81 = vsyncadd [#allocation3], 4294967168  ;;  %s85_s11 = smov [#allocation5]   ;;  %v21_v0 = vld [vmem:[#allocation2] sm:$0xff] }
   0xe   :  { %s29_s12 = sshll.u32 %s85_s11, 4  ;;  %22 = vst [vmem:[#allocation5] sm:$0xff] %v21_v0  ;;  %s30_s12 = int_to_ptr.vmem [resolvable:$true] %s29_s12 }
   0xf   :  { %s60_s13 = scalar_lea.vmem %s30_s12, 128  ;;  %p65_p6 = scmp.lt.s32.totalorder %s30_s12, %s30_s12 }
  0x10   :  { %p61_p5 = scmp.ne.s32.totalorder %s30_s12, %s60_s13  ;;  %p66_p7 = scmp.lt.s32.totalorder %s60_s13, %s60_s13 }
  0x12   :  { %p67_p8 = por %p66_p7, %p65_p6 }
  0x14   :  { %p68_p9 = pnand %p67_p8, %p61_p5 }
  0x16   :  { %71 = shalt.err (!%p68_p9)
}
  0x17   :  { %32 = dma.vmem_to_hbm [thread:$0]  %s30_s12, 128, %s103_s1, [#allocation4]  }
  0x18   :  { %82 = dma.done.wait [#allocation4], 128  }
  0x19   :  { %83 = vsyncadd [#allocation4], 4294967168 }
  0x1a   :  { %36 = vsyncpa [#allocation3], 1 }
  0x1b   :  { %37 = vsyncpa [#allocation4], 1 }

</bundles_post_ra>
